<compile_context>
chip_gen: v7x
topology: tpu7x:2x2x1
jax: 0.10.0
libtpu: 0.0.40
codegen_flags: <defaults>
</compile_context>

<pallas_src>
import functools
import math

import jax
import jax.numpy as jnp
from jax.experimental import pallas as pl
from jax.experimental.pallas import tpu as pltpu

LN_EPS = 1e-5
BN_EPS = 1e-5
LEAKY_SLOPE = 0.01
NUM_HEADS = 4                     # fixed inside SelfAttention (nn.MultiheadAttention(channels, 4))
INV_SQRT2 = 1.0 / math.sqrt(2.0)
_HIGHEST = jax.lax.Precision.HIGHEST

LANE = 128                        # TPU vreg lane width
LANES_BATCH_MIN = 128             # switch to the lane-dense (batch-on-lanes) layout at this B
MAX_TILE_LANES = 1024             # batch-tile cap (lanes) for the lane-dense layout


def _leaky_relu(x):
    return jnp.where(x >= 0, x, LEAKY_SLOPE * x)


def _gelu_exact(x):
    # nn.GELU() default is the exact erf form
    return 0.5 * x * (1.0 + jax.lax.erf(x * INV_SQRT2))


# --------------------------------------------------------------------------------------
# Kernel A — small batches.  Activations are (B, S); single grid step.
#   wmat_ref packs [W_att ; FF_W1 ; FF_W2 ; A_eff] row-wise, all in (in, out) layout.
#   vec_ref packs every bias / LayerNorm vector as one padded row.
# --------------------------------------------------------------------------------------
def _ps_pred_kernel_rows(x_ref, wmat_ref, vec_ref, out_ref, *, S, H):
    x = x_ref[...]                                        # (Bt, S)

    w_att = wmat_ref[0:S, 0:S]
    ff_w1 = wmat_ref[S:2 * S, 0:S]
    ff_w2 = wmat_ref[2 * S:3 * S, 0:S]
    a_eff = wmat_ref[3 * S:4 * S, 0:H]

    ln1_w = vec_ref[0:1, 0:S]
    ln1_b = vec_ref[1:2, 0:S]
    b_att = vec_ref[2:3, 0:S]
    ln2_w = vec_ref[3:4, 0:S]
    ln2_b = vec_ref[4:5, 0:S]
    ff_b1 = vec_ref[5:6, 0:S]
    ff_b2 = vec_ref[6:7, 0:S]
    b_eff = vec_ref[7:8, 0:H]
    fc2_w = vec_ref[8:9, 0:H]
    fc2_b = vec_ref[9:10, 0:1]

    def ln(v, w, b):                                      # LayerNorm over the lane (feature) axis
        mu = jnp.mean(v, axis=-1, keepdims=True)
        var = jnp.mean((v - mu) ** 2, axis=-1, keepdims=True)
        return (v - mu) * jax.lax.rsqrt(var + LN_EPS) * w + b

    # SelfAttention with a length-1 token axis: softmax over one key == 1, so MHA == out_proj(V).
    x_ln = ln(x, ln1_w, ln1_b)
    attn = jnp.dot(x_ln, w_att, precision=_HIGHEST,
                   preferred_element_type=jnp.float32) + b_att
    h = attn + x                                          # residual 1

    g = ln(h, ln2_w, ln2_b)
    g = jnp.dot(g, ff_w1, precision=_HIGHEST, preferred_element_type=jnp.float32) + ff_b1
    g = _gelu_exact(g)
    g = jnp.dot(g, ff_w2, precision=_HIGHEST, preferred_element_type=jnp.float32) + ff_b2
    s = g + h                                             # (Bt, S)

    # Conv1d + BatchNorm1d(eval) + Flatten + fc1, pre-folded into one matmul.
    y = jnp.dot(s, a_eff, precision=_HIGHEST, preferred_element_type=jnp.float32) + b_eff
    y = _leaky_relu(y)

    # fc2 (output width 1): elementwise mul + lane reduce (avoids a width-1 matmul).
    y = jnp.sum(y * fc2_w, axis=-1, keepdims=True) + fc2_b
    y = _leaky_relu(y)

    out_ref[...] = y.astype(out_ref.dtype)


# --------------------------------------------------------------------------------------
# Kernel B — large batches, lane-dense layout.  Activations are (features, Bt) so the
# batch rides the 128-lane axis and the output block (1, Bt) is a dense, unmasked store.
#   wmat_ref packs [W_att^T ; FF_W1^T ; FF_W2^T ; A_eff^T] row-wise ((out, in) layout).
#   vec_ref stores each bias / LayerNorm vector as one column.
# --------------------------------------------------------------------------------------
def _ps_pred_kernel_lanes(x_ref, wmat_ref, vec_ref, out_ref, *, S, H):
    xt = x_ref[...]                                       # (S, Bt)

    w_att = wmat_ref[0:S, 0:S]                            # (out, in)
    ff_w1 = wmat_ref[S:2 * S, 0:S]
    ff_w2 = wmat_ref[2 * S:3 * S, 0:S]
    a_eff = wmat_ref[3 * S:3 * S + H, 0:S]                # (H, S)

    ln1_w = vec_ref[0:S, 0:1]
    ln1_b = vec_ref[0:S, 1:2]
    b_att = vec_ref[0:S, 2:3]
    ln2_w = vec_ref[0:S, 3:4]
    ln2_b = vec_ref[0:S, 4:5]
    ff_b1 = vec_ref[0:S, 5:6]
    ff_b2 = vec_ref[0:S, 6:7]
    b_eff = vec_ref[0:H, 7:8]
    fc2_w = vec_ref[0:H, 8:9]
    fc2_b = vec_ref[0:1, 9:10]

    def ln(v, w, b):                                      # LayerNorm over the sublane (feature) axis
        mu = jnp.mean(v, axis=0, keepdims=True)
        var = jnp.mean((v - mu) ** 2, axis=0, keepdims=True)
        return (v - mu) * jax.lax.rsqrt(var + LN_EPS) * w + b

    x_ln = ln(xt, ln1_w, ln1_b)
    attn = jnp.dot(w_att, x_ln, precision=_HIGHEST,
                   preferred_element_type=jnp.float32) + b_att
    h = attn + xt                                         # residual 1

    g = ln(h, ln2_w, ln2_b)
    g = jnp.dot(ff_w1, g, precision=_HIGHEST, preferred_element_type=jnp.float32) + ff_b1
    g = _gelu_exact(g)
    g = jnp.dot(ff_w2, g, precision=_HIGHEST, preferred_element_type=jnp.float32) + ff_b2
    s = g + h                                             # (S, Bt)

    y = jnp.dot(a_eff, s, precision=_HIGHEST, preferred_element_type=jnp.float32) + b_eff
    y = _leaky_relu(y)                                    # (H, Bt)

    y = jnp.sum(y * fc2_w, axis=0, keepdims=True) + fc2_b  # (1, Bt)
    y = _leaky_relu(y)

    out_ref[...] = y.astype(out_ref.dtype)


# --------------------------------------------------------------------------------------
# Wrapper-side folding and operand packing
# --------------------------------------------------------------------------------------
def _fold_params(params, *, seq_len, hidden, cnn1):
    """Algebraic folding (done once, outside the kernel)."""
    C = seq_len

    # attention: fold V projection and out_proj into one (in, out) matrix
    wv = params["in_proj_w"][2 * C:]                      # (C, C)
    bv = params["in_proj_b"][2 * C:].reshape(1, C)
    wo, bo = params["wo"], params["bo"]
    w_att = jnp.matmul(wv.T, wo.T, precision=_HIGHEST)    # (C, C) in (in, out) layout
    b_att = jnp.matmul(bv, wo.T, precision=_HIGHEST) + bo  # (1, C)

    # feed-forward: pre-transpose to (in, out)
    ff_w1_t = params["ff_w1"].T
    ff_w2_t = params["ff_w2"].T

    # conv(k=3, pad=1, in_ch=1) + BN(eval) + Flatten + fc1  ->  y = s @ A_eff + b_eff
    scale = params["bn_g"] * jax.lax.rsqrt(params["bn_v"] + BN_EPS)       # (O,)
    shift = params["bn_b"] - params["bn_m"] * scale                       # (O,)
    F = params["fc1_w"].reshape(hidden, cnn1, C)                          # (H, O, S)
    Fs = F * scale[None, :, None]                                         # BN scale folded
    w0 = params["conv_w"][:, 0]
    w1 = params["conv_w"][:, 1]
    w2 = params["conv_w"][:, 2]
    # tap shifts: s[j] feeds conv position j+1 via w0, j via w1, j-1 via w2 (zero pad edges)
    Fs_prev = jnp.pad(Fs[:, :, 1:], ((0, 0), (0, 0), (0, 1)))             # Fs[h,o,j+1]
    Fs_next = jnp.pad(Fs[:, :, :-1], ((0, 0), (0, 0), (1, 0)))            # Fs[h,o,j-1]
    a_eff = (jnp.einsum("hoj,o->jh", Fs, w1, precision=_HIGHEST)
             + jnp.einsum("hoj,o->jh", Fs_prev, w0, precision=_HIGHEST)
             + jnp.einsum("hoj,o->jh", Fs_next, w2, precision=_HIGHEST))  # (S, H)
    per_ch = scale * params["conv_b"] + shift                             # (O,)
    b_eff = params["fc1_b"] + jnp.einsum(
        "hoj,o->h", F, per_ch, precision=_HIGHEST)[None, :]               # (1, H)

    return dict(ln1_w=params["ln1_w"], ln1_b=params["ln1_b"],
                w_att=w_att, b_att=b_att,
                ln2_w=params["ln2_w"], ln2_b=params["ln2_b"],
                ff_w1_t=ff_w1_t, ff_b1=params["ff_b1"],
                ff_w2_t=ff_w2_t, ff_b2=params["ff_b2"],
                a_eff=a_eff, b_eff=b_eff,
                fc2_w=params["fc2_w"], fc2_b=params["fc2_b"])


def _pack_operands(f, *, S, H, batch_on_lanes):
    """Pack all 14 weights into two VMEM-resident slabs (3 kernel inputs total)."""
    W = max(S, H)

    def pad_cols(m, w):
        return jnp.pad(m, ((0, 0), (0, w - m.shape[1])))

    vec_rows = [f["ln1_w"], f["ln1_b"], f["b_att"], f["ln2_w"], f["ln2_b"],
                f["ff_b1"], f["ff_b2"], f["b_eff"], f["fc2_w"], f["fc2_b"]]
    vecs = jnp.concatenate([pad_cols(v, W) for v in vec_rows], axis=0)    # (10, W)
    vecs = jnp.pad(vecs, ((0, 16 - vecs.shape[0]), (0, 0)))               # (16, W), sublane-tidy

    if not batch_on_lanes:
        wmat = jnp.concatenate(
            [pad_cols(f["w_att"], W), pad_cols(f["ff_w1_t"], W),
             pad_cols(f["ff_w2_t"], W), pad_cols(f["a_eff"], W)], axis=0)  # (4S, W), (in,out)
        return wmat, vecs

    # lane-dense kernel: matrices in (out, in) layout (all have S columns) stacked row-wise,
    # vectors as columns of the transposed vec slab -> every slice starts at lane offset 0
    # (matrices) or is a single-lane column (vectors).
    wmat_t = jnp.concatenate(
        [f["w_att"].T, f["ff_w1_t"].T, f["ff_w2_t"].T, f["a_eff"].T], axis=0)  # (3S+H, S)
    return wmat_t, vecs.T                                                      # (W, 16)


def _ceil_div(a, b):
    return -(-a // b)


def ps_pred_forward(x, params, *, seq_len, hidden, cnn1):
    """x: (batch, seq_len) float32 — the module's x.reshape(B, S, 1, 1) collapsed."""
    B, S = x.shape
    H = hidden
    assert S == seq_len and seq_len % NUM_HEADS == 0

    folded = _fold_params(params, seq_len=seq_len, hidden=hidden, cnn1=cnn1)

    if B < LANES_BATCH_MIN:
        # Small batch: single grid step, (B, S) layout; launch overhead dominates anyway.
        wmat, vecs = _pack_operands(folded, S=S, H=H, batch_on_lanes=False)
        return pl.pallas_call(
            functools.partial(_ps_pred_kernel_rows, S=S, H=H),
            out_shape=jax.ShapeDtypeStruct((B, 1), jnp.float32),
            grid_spec=pltpu.PrefetchScalarGridSpec(
                num_scalar_prefetch=0,
                grid=(1,),
                in_specs=[pl.BlockSpec((B, S), lambda i: (0, 0)),
                          pl.BlockSpec(wmat.shape, lambda i: (0, 0)),
                          pl.BlockSpec(vecs.shape, lambda i: (0, 0))],
                out_specs=pl.BlockSpec((B, 1), lambda i: (0, 0))),
            compiler_params=pltpu.CompilerParams(
                dimension_semantics=("arbitrary",)),
        )(x, wmat, vecs)

    # Large batch: lane-dense layout (batch on the 128-lane axis), resident packed weights.
    wmat_t, vecs_t = _pack_operands(folded, S=S, H=H, batch_on_lanes=True)

    n_lane_blocks = _ceil_div(B, LANE)
    if n_lane_blocks == 1:
        steps, bt = 1, LANE
    else:
        # >= 2 grid steps (v7x: both TensorCores get work), tiles capped at MAX_TILE_LANES.
        steps = max(2, _ceil_div(B, MAX_TILE_LANES))
        bt = _ceil_div(n_lane_blocks, steps) * LANE
    b_total = steps * bt
    xt = jnp.pad(x, ((0, b_total - B), (0, 0))).T          # (S, b_total); padded rows are zeros

    out_t = pl.pallas_call(
        functools.partial(_ps_pred_kernel_lanes, S=S, H=H),
        out_shape=jax.ShapeDtypeStruct((1, b_total), jnp.float32),
        grid_spec=pltpu.PrefetchScalarGridSpec(
            num_scalar_prefetch=0,
            grid=(steps,),
            in_specs=[pl.BlockSpec((S, bt), lambda i: (0, i)),
                      pl.BlockSpec(wmat_t.shape, lambda i: (0, 0)),
                      pl.BlockSpec(vecs_t.shape, lambda i: (0, 0))],
            out_specs=pl.BlockSpec((1, bt), lambda i: (0, i))),
        compiler_params=pltpu.CompilerParams(
            dimension_semantics=("parallel",)),             # shard batch tiles across TCs (v7x)
    )(xt, wmat_t, vecs_t)
    return out_t[0, :B].reshape(B, 1)


# ----------------------------- pure-JAX reference -----------------------------
def ps_pred_reference(x, p, *, seq_len, hidden, cnn1):
    B, S = x.shape
    C = S
    hd = C // NUM_HEADS

    def ln(v, w, b):
        mu = v.mean(-1, keepdims=True)
        var = ((v - mu) ** 2).mean(-1, keepdims=True)
        return (v - mu) / jnp.sqrt(var + LN_EPS) * w + b

    xs = x[:, None, :]                                        # (B, 1, C) batch_first tokens
    x_ln = ln(xs, p["ln1_w"][0], p["ln1_b"][0])
    W, bqkv = p["in_proj_w"], p["in_proj_b"]
    q = x_ln @ W[:C].T + bqkv[:C]
    k = x_ln @ W[C:2 * C].T + bqkv[C:2 * C]
    v = x_ln @ W[2 * C:].T + bqkv[2 * C:]

    def split(t):
        return t.reshape(B, 1, NUM_HEADS, hd).transpose(0, 2, 1, 3)

    qh, kh, vh = split(q), split(k), split(v)
    scores = jnp.einsum("bhqd,bhkd->bhqk", qh, kh) / jnp.sqrt(float(hd))
    attn = jax.nn.softmax(scores, axis=-1)
    oh = jnp.einsum("bhqk,bhkd->bhqd", attn, vh)
    o = oh.transpose(0, 2, 1, 3).reshape(B, 1, C) @ p["wo"].T + p["bo"][0]

    h1 = o + xs
    g = ln(h1, p["ln2_w"][0], p["ln2_b"][0])
    g = g @ p["ff_w1"].T + p["ff_b1"][0]
    g = 0.5 * g * (1.0 + jax.lax.erf(g * INV_SQRT2))
    g = g @ p["ff_w2"].T + p["ff_b2"][0]
    s = (g + h1)[:, 0, :]                                      # (B, C)

    pad = jnp.pad(s, ((0, 0), (1, 1)))
    conv = jnp.stack(
        [p["conv_w"][o_, 0] * pad[:, :C]
         + p["conv_w"][o_, 1] * pad[:, 1:C + 1]
         + p["conv_w"][o_, 2] * pad[:, 2:C + 2]
         + p["conv_b"][o_] for o_ in range(cnn1)], axis=1)      # (B, CNN1, C)
    bn = ((conv - p["bn_m"][None, :, None])
          / jnp.sqrt(p["bn_v"][None, :, None] + BN_EPS)
          * p["bn_g"][None, :, None] + p["bn_b"][None, :, None])
    flat = bn.reshape(B, cnn1 * C)
    y = flat @ p["fc1_w"].T + p["fc1_b"][0]
    y = jnp.where(y >= 0, y, LEAKY_SLOPE * y)
    y = y @ p["fc2_w"].T + p["fc2_b"][0]
    y = jnp.where(y >= 0, y, LEAKY_SLOPE * y)
    return y


def init_params(key, seq_len, hidden, cnn1):
    C = seq_len
    ks = jax.random.split(key, 22)
    f = lambda k, shp, s=0.2: s * jax.random.normal(k, shp, dtype=jnp.float32)
    return {
        "ln1_w": f(ks[0], (1, C), 0.1) + 1.0,
        "ln1_b": f(ks[1], (1, C)),
        "in_proj_w": f(ks[2], (3 * C, C)),     # packed q/k/v projection (3C, C)
        "in_proj_b": f(ks[3], (3 * C,)),
        "wo": f(ks[4], (C, C)),
        "bo": f(ks[5], (1, C)),
        "ln2_w": f(ks[6], (1, C), 0.1) + 1.0,
        "ln2_b": f(ks[7], (1, C)),
        "ff_w1": f(ks[8], (C, C)),
        "ff_b1": f(ks[9], (1, C)),
        "ff_w2": f(ks[10], (C, C)),
        "ff_b2": f(ks[11], (1, C)),
        "conv_w": f(ks[12], (cnn1, 3)),        # Conv1d weight (cnn1, in_dim=1, 3) squeezed
        "conv_b": f(ks[13], (cnn1,)),
        "bn_g": f(ks[14], (cnn1,), 0.1) + 1.0,
        "bn_b": f(ks[15], (cnn1,)),
        "bn_m": f(ks[16], (cnn1,)),
        "bn_v": jnp.abs(f(ks[17], (cnn1,))) + 0.5,
        "fc1_w": f(ks[18], (hidden, cnn1 * C)),
        "fc1_b": f(ks[19], (1, hidden)),
        "fc2_w": f(ks[20], (1, hidden)),
        "fc2_b": f(ks[21], (1, 1)),
    }


if __name__ == "__main__":
    # Module config: ps_pred(in_dim=1, seq_len=16, ln_hiddensize=32, batch_size=B, cnn1=4)
    # (the forward pass requires in_dim == 1: squeeze(3) + permute(0,2,1) + Conv1d(in=1)).
    in_dim, seq_len, hidden, cnn1 = 1, 16, 32, 4

    key = jax.random.PRNGKey(0)
    kp, k_small, k_pad, k_big = jax.random.split(key, 4)
    params = init_params(kp, seq_len, hidden, cnn1)

    # exact f32 matmuls in the reference (kernel dots already request HIGHEST explicitly)
    with jax.default_matmul_precision("highest"):
        # B=8: small-batch (B,S)-layout path; B=200: lane-dense path with padding (200->256);
        # B=256: lane-dense path, 2 "parallel" grid steps (exercises the multi-tile path).
        for B, kx in ((8, k_small), (200, k_pad), (256, k_big)):
            x = jax.random.normal(kx, (B, seq_len), dtype=jnp.float32)   # == (B, S, 1, 1) view
            out = jax.block_until_ready(
                ps_pred_forward(x, params, seq_len=seq_len, hidden=hidden, cnn1=cnn1))
            assert out.shape == (B, 1), out.shape

            ref = jax.block_until_ready(
                ps_pred_reference(x, params, seq_len=seq_len, hidden=hidden, cnn1=cnn1))
            err = float(jnp.max(jnp.abs(out - ref)))
            assert err < 5e-4, f"B={B}: mismatch vs reference: {err}"

    print("KERNEL_OK")
</pallas_src>

<mosaic_0001>
module attributes {stable_mosaic.version = 11 : i64} {
  func.func @_ps_pred_kernel_rows(%arg0: i32, %arg1: memref<8x16xf32, #tpu.memory_space<vmem>>, %arg2: memref<64x32xf32, #tpu.memory_space<vmem>>, %arg3: memref<16x32xf32, #tpu.memory_space<vmem>>, %arg4: memref<8x1xf32, #tpu.memory_space<vmem>>) attributes {dimension_semantics = [#tpu.dimension_semantics<arbitrary>], iteration_bounds = array<i64: 1>, scalar_prefetch = 0 : i64, scratch_operands = 0 : i64, tpu.core_type = #tpu.core_type<tc>, window_params = [{pipeline_mode = #tpu.pipeline_mode<synchronous>, transform_indices = @transform_0, window_bounds = array<i64: 8, 16>}, {pipeline_mode = #tpu.pipeline_mode<synchronous>, transform_indices = @transform_1, window_bounds = array<i64: 64, 32>}, {pipeline_mode = #tpu.pipeline_mode<synchronous>, transform_indices = @transform_2, window_bounds = array<i64: 16, 32>}, {pipeline_mode = #tpu.pipeline_mode<synchronous>, transform_indices = @transform_3, window_bounds = array<i64: 8, 1>}]} {
    %c0 = arith.constant 0 : index
    %c0_0 = arith.constant 0 : index
    %0 = vector.load %arg1[%c0, %c0_0] : memref<8x16xf32, #tpu.memory_space<vmem>>, vector<8x16xf32>
    %c0_1 = arith.constant 0 : index
    %c0_2 = arith.constant 0 : index
    %1 = vector.load %arg2[%c0_1, %c0_2] : memref<64x32xf32, #tpu.memory_space<vmem>>, vector<16x16xf32>
    %c16 = arith.constant 16 : index
    %c0_3 = arith.constant 0 : index
    %2 = vector.load %arg2[%c16, %c0_3] : memref<64x32xf32, #tpu.memory_space<vmem>>, vector<16x16xf32>
    %c32 = arith.constant 32 : index
    %c0_4 = arith.constant 0 : index
    %3 = vector.load %arg2[%c32, %c0_4] : memref<64x32xf32, #tpu.memory_space<vmem>>, vector<16x16xf32>
    %c48 = arith.constant 48 : index
    %c0_5 = arith.constant 0 : index
    %4 = vector.load %arg2[%c48, %c0_5] : memref<64x32xf32, #tpu.memory_space<vmem>>, vector<16x32xf32>
    %c0_6 = arith.constant 0 : index
    %c0_7 = arith.constant 0 : index
    %5 = vector.load %arg3[%c0_6, %c0_7] : memref<16x32xf32, #tpu.memory_space<vmem>>, vector<1x16xf32>
    %c1 = arith.constant 1 : index
    %c0_8 = arith.constant 0 : index
    %6 = vector.load %arg3[%c1, %c0_8] : memref<16x32xf32, #tpu.memory_space<vmem>>, vector<1x16xf32>
    %c2 = arith.constant 2 : index
    %c0_9 = arith.constant 0 : index
    %7 = vector.load %arg3[%c2, %c0_9] : memref<16x32xf32, #tpu.memory_space<vmem>>, vector<1x16xf32>
    %c3 = arith.constant 3 : index
    %c0_10 = arith.constant 0 : index
    %8 = vector.load %arg3[%c3, %c0_10] : memref<16x32xf32, #tpu.memory_space<vmem>>, vector<1x16xf32>
    %c4 = arith.constant 4 : index
    %c0_11 = arith.constant 0 : index
    %9 = vector.load %arg3[%c4, %c0_11] : memref<16x32xf32, #tpu.memory_space<vmem>>, vector<1x16xf32>
    %c5 = arith.constant 5 : index
    %c0_12 = arith.constant 0 : index
    %10 = vector.load %arg3[%c5, %c0_12] : memref<16x32xf32, #tpu.memory_space<vmem>>, vector<1x16xf32>
    %c6 = arith.constant 6 : index
    %c0_13 = arith.constant 0 : index
    %11 = vector.load %arg3[%c6, %c0_13] : memref<16x32xf32, #tpu.memory_space<vmem>>, vector<1x16xf32>
    %c7 = arith.constant 7 : index
    %c0_14 = arith.constant 0 : index
    %12 = vector.load %arg3[%c7, %c0_14] : memref<16x32xf32, #tpu.memory_space<vmem>>, vector<1x32xf32>
    %c8 = arith.constant 8 : index
    %c0_15 = arith.constant 0 : index
    %13 = vector.load %arg3[%c8, %c0_15] : memref<16x32xf32, #tpu.memory_space<vmem>>, vector<1x32xf32>
    %c9 = arith.constant 9 : index
    %c0_16 = arith.constant 0 : index
    %14 = vector.load %arg3[%c9, %c0_16] : memref<16x32xf32, #tpu.memory_space<vmem>>, vector<1x1xf32>
    %cst = arith.constant dense<0.000000e+00> : vector<8xf32>
    %15 = vector.multi_reduction <add>, %0, %cst [1] : vector<8x16xf32> to vector<8xf32>
    %16 = vector.shape_cast %15 : vector<8xf32> to vector<8x1xf32>
    %cst_17 = arith.constant 1.600000e+01 : f32
    %17 = vector.broadcast %cst_17 : f32 to vector<8x1xf32>
    %18 = arith.divf %16, %17 : vector<8x1xf32>
    %19 = vector.broadcast %18 : vector<8x1xf32> to vector<8x16xf32>
    %20 = arith.subf %0, %19 : vector<8x16xf32>
    %21 = arith.mulf %20, %20 : vector<8x16xf32>
    %cst_18 = arith.constant dense<0.000000e+00> : vector<8xf32>
    %22 = vector.multi_reduction <add>, %21, %cst_18 [1] : vector<8x16xf32> to vector<8xf32>
    %23 = vector.shape_cast %22 : vector<8xf32> to vector<8x1xf32>
    %cst_19 = arith.constant 1.600000e+01 : f32
    %24 = vector.broadcast %cst_19 : f32 to vector<8x1xf32>
    %25 = arith.divf %23, %24 : vector<8x1xf32>
    %26 = vector.broadcast %18 : vector<8x1xf32> to vector<8x16xf32>
    %27 = arith.subf %0, %26 : vector<8x16xf32>
    %cst_20 = arith.constant 9.99999974E-6 : f32
    %28 = vector.broadcast %cst_20 : f32 to vector<8x1xf32>
    %29 = arith.addf %25, %28 : vector<8x1xf32>
    %30 = math.rsqrt %29 : vector<8x1xf32>
    %31 = vector.broadcast %30 : vector<8x1xf32> to vector<8x16xf32>
    %32 = arith.mulf %27, %31 : vector<8x16xf32>
    %33 = vector.broadcast %5 : vector<1x16xf32> to vector<8x16xf32>
    %34 = arith.mulf %32, %33 : vector<8x16xf32>
    %35 = vector.broadcast %6 : vector<1x16xf32> to vector<8x16xf32>
    %36 = arith.addf %34, %35 : vector<8x16xf32>
    %cst_21 = arith.constant dense<0.000000e+00> : vector<8x16xf32>
    %37 = tpu.matmul %36, %1, %cst_21 {dimension_numbers = #tpu.dot_dimension_numbers<[1], [0], [0], [1], [0, 0, 1, 1], [], []>, precision = #tpu.contract_precision<fp32>} : vector<8x16xf32>, vector<16x16xf32>, vector<8x16xf32> -> vector<8x16xf32>
    %38 = vector.broadcast %7 : vector<1x16xf32> to vector<8x16xf32>
    %39 = arith.addf %37, %38 : vector<8x16xf32>
    %40 = arith.addf %39, %0 : vector<8x16xf32>
    %cst_22 = arith.constant dense<0.000000e+00> : vector<8xf32>
    %41 = vector.multi_reduction <add>, %40, %cst_22 [1] : vector<8x16xf32> to vector<8xf32>
    %42 = vector.shape_cast %41 : vector<8xf32> to vector<8x1xf32>
    %cst_23 = arith.constant 1.600000e+01 : f32
    %43 = vector.broadcast %cst_23 : f32 to vector<8x1xf32>
    %44 = arith.divf %42, %43 : vector<8x1xf32>
    %45 = vector.broadcast %44 : vector<8x1xf32> to vector<8x16xf32>
    %46 = arith.subf %40, %45 : vector<8x16xf32>
    %47 = arith.mulf %46, %46 : vector<8x16xf32>
    %cst_24 = arith.constant dense<0.000000e+00> : vector<8xf32>
    %48 = vector.multi_reduction <add>, %47, %cst_24 [1] : vector<8x16xf32> to vector<8xf32>
    %49 = vector.shape_cast %48 : vector<8xf32> to vector<8x1xf32>
    %cst_25 = arith.constant 1.600000e+01 : f32
    %50 = vector.broadcast %cst_25 : f32 to vector<8x1xf32>
    %51 = arith.divf %49, %50 : vector<8x1xf32>
    %52 = vector.broadcast %44 : vector<8x1xf32> to vector<8x16xf32>
    %53 = arith.subf %40, %52 : vector<8x16xf32>
    %cst_26 = arith.constant 9.99999974E-6 : f32
    %54 = vector.broadcast %cst_26 : f32 to vector<8x1xf32>
    %55 = arith.addf %51, %54 : vector<8x1xf32>
    %56 = math.rsqrt %55 : vector<8x1xf32>
    %57 = vector.broadcast %56 : vector<8x1xf32> to vector<8x16xf32>
    %58 = arith.mulf %53, %57 : vector<8x16xf32>
    %59 = vector.broadcast %8 : vector<1x16xf32> to vector<8x16xf32>
    %60 = arith.mulf %58, %59 : vector<8x16xf32>
    %61 = vector.broadcast %9 : vector<1x16xf32> to vector<8x16xf32>
    %62 = arith.addf %60, %61 : vector<8x16xf32>
    %cst_27 = arith.constant dense<0.000000e+00> : vector<8x16xf32>
    %63 = tpu.matmul %62, %2, %cst_27 {dimension_numbers = #tpu.dot_dimension_numbers<[1], [0], [0], [1], [0, 0, 1, 1], [], []>, precision = #tpu.contract_precision<fp32>} : vector<8x16xf32>, vector<16x16xf32>, vector<8x16xf32> -> vector<8x16xf32>
    %64 = vector.broadcast %10 : vector<1x16xf32> to vector<8x16xf32>
    %65 = arith.addf %63, %64 : vector<8x16xf32>
    %cst_28 = arith.constant 5.000000e-01 : f32
    %66 = vector.broadcast %cst_28 : f32 to vector<8x16xf32>
    %67 = arith.mulf %66, %65 : vector<8x16xf32>
    %cst_29 = arith.constant 0.707106769 : f32
    %68 = vector.broadcast %cst_29 : f32 to vector<8x16xf32>
    %69 = arith.mulf %65, %68 : vector<8x16xf32>
    %70 = math.erf %69 : vector<8x16xf32>
    %cst_30 = arith.constant 1.000000e+00 : f32
    %71 = vector.broadcast %cst_30 : f32 to vector<8x16xf32>
    %72 = arith.addf %71, %70 : vector<8x16xf32>
    %73 = arith.mulf %67, %72 : vector<8x16xf32>
    %cst_31 = arith.constant dense<0.000000e+00> : vector<8x16xf32>
    %74 = tpu.matmul %73, %3, %cst_31 {dimension_numbers = #tpu.dot_dimension_numbers<[1], [0], [0], [1], [0, 0, 1, 1], [], []>, precision = #tpu.contract_precision<fp32>} : vector<8x16xf32>, vector<16x16xf32>, vector<8x16xf32> -> vector<8x16xf32>
    %75 = vector.broadcast %11 : vector<1x16xf32> to vector<8x16xf32>
    %76 = arith.addf %74, %75 : vector<8x16xf32>
    %77 = arith.addf %76, %40 : vector<8x16xf32>
    %cst_32 = arith.constant dense<0.000000e+00> : vector<8x32xf32>
    %78 = tpu.matmul %77, %4, %cst_32 {dimension_numbers = #tpu.dot_dimension_numbers<[1], [0], [0], [1], [0, 0, 1, 1], [], []>, precision = #tpu.contract_precision<fp32>} : vector<8x16xf32>, vector<16x32xf32>, vector<8x32xf32> -> vector<8x32xf32>
    %79 = vector.broadcast %12 : vector<1x32xf32> to vector<8x32xf32>
    %80 = arith.addf %78, %79 : vector<8x32xf32>
    %cst_33 = arith.constant 0.000000e+00 : f32
    %81 = vector.broadcast %cst_33 : f32 to vector<8x32xf32>
    %82 = arith.cmpf oge, %80, %81 : vector<8x32xf32>
    %cst_34 = arith.constant 0.00999999977 : f32
    %83 = vector.broadcast %cst_34 : f32 to vector<8x32xf32>
    %84 = arith.mulf %83, %80 : vector<8x32xf32>
    %85 = arith.select %82, %80, %84 : vector<8x32xi1>, vector<8x32xf32>
    %86 = vector.broadcast %13 : vector<1x32xf32> to vector<8x32xf32>
    %87 = arith.mulf %85, %86 : vector<8x32xf32>
    %cst_35 = arith.constant dense<0.000000e+00> : vector<8xf32>
    %88 = vector.multi_reduction <add>, %87, %cst_35 [1] : vector<8x32xf32> to vector<8xf32>
    %89 = vector.shape_cast %88 : vector<8xf32> to vector<8x1xf32>
    %90 = vector.broadcast %14 : vector<1x1xf32> to vector<8x1xf32>
    %91 = arith.addf %89, %90 : vector<8x1xf32>
    %cst_36 = arith.constant 0.000000e+00 : f32
    %92 = vector.broadcast %cst_36 : f32 to vector<8x1xf32>
    %93 = arith.cmpf oge, %91, %92 : vector<8x1xf32>
    %cst_37 = arith.constant 0.00999999977 : f32
    %94 = vector.broadcast %cst_37 : f32 to vector<8x1xf32>
    %95 = arith.mulf %94, %91 : vector<8x1xf32>
    %96 = arith.select %93, %91, %95 : vector<8x1xi1>, vector<8x1xf32>
    %c0_38 = arith.constant 0 : index
    %c0_39 = arith.constant 0 : index
    %97 = vector.load %arg4[%c0_38, %c0_39] : memref<8x1xf32, #tpu.memory_space<vmem>>, vector<8x1xf32>
    tpu.vector_store %arg4[%c0_38, %c0_39], %96 {strides = array<i32>} : memref<8x1xf32, #tpu.memory_space<vmem>>, vector<8x1xf32>,
    return
  }
  func.func @transform_0(%arg0: i32) -> (i32, i32) {
    %c0_i32 = arith.constant 0 : i32
    %c0_i32_0 = arith.constant 0 : i32
    %c0_i32_1 = arith.constant 0 : i32
    return %c0_i32, %c0_i32_0 : i32, i32
  }
  func.func @transform_1(%arg0: i32) -> (i32, i32) {
    %c0_i32 = arith.constant 0 : i32
    %c0_i32_0 = arith.constant 0 : i32
    %c0_i32_1 = arith.constant 0 : i32
    return %c0_i32, %c0_i32_0 : i32, i32
  }
  func.func @transform_2(%arg0: i32) -> (i32, i32) {
    %c0_i32 = arith.constant 0 : i32
    %c0_i32_0 = arith.constant 0 : i32
    %c0_i32_1 = arith.constant 0 : i32
    return %c0_i32, %c0_i32_0 : i32, i32
  }
  func.func @transform_3(%arg0: i32) -> (i32, i32) {
    %c0_i32 = arith.constant 0 : i32
    %c0_i32_0 = arith.constant 0 : i32
    %c0_i32_1 = arith.constant 0 : i32
    return %c0_i32, %c0_i32_0 : i32, i32
  }
}

</mosaic_0001>

<bundles_post_ra>
// kernel: tpu_custom_call.1
= control target key start
LH: loop header
LB: loop body
LE: loop exit
PB: predicated region body
PF: predicated region fallthrough
CT: control target
= control target key end

     0   :  { %vm33_vm0 = vcmask 130048   ;;  %v2331_v7 = vmov 0.0|0.0   ;;  %vm2332_vm1 = vmmov 0   ;;  %v2333_v10 = vmov 0.0   ;;  %s2504_s0 = inlined_call_operand.vmem [shape: f32[8,16], index: 0, kind: input, shape index: {}]   ;;  %s2505_s1 = inlined_call_operand.vmem [shape: f32[64,32], index: 1, kind: input, shape index: {}]   ;;  %s2506_s2 = inlined_call_operand.vmem [shape: f32[16,32], index: 2, kind: input, shape index: {}]   ;;  %s2507_s3 = inlined_call_operand.vmem [shape: f32[8,1], index: 3, kind: output, shape index: {}]  }
   0x1   :  { %v2357_v0 = vld [vmem:[%s2504_s0] sm:$0xff]  ;;  %2228 = vmatprep.subr.bf16.mxu1 %v2331_v7  ;;  %v16_v9 = vld [vmem:[%s2505_s1 + $0x8] sm:$0xff]  ;;  %2064 = vmatprep.mubr.msk.f32.mxu1 %vm2332_vm1, %v2333_v10  ;;  %vm1960_vm3 = vcmask 261120   ;;  %vm1972_vm4 = vcmask 7168  }
   0x2   :  { %v34_v1 = vsel %vm33_vm0, %v2357_v0, 0.0  ;;  %v15_v8 = vld [vmem:[%s2505_s1] sm:$0xff]  ;;  %v69_v12 = vand.u32 4294901760, %v16_v9  ;;  %2246 = vmatprep.subr.bf16.mxu0 %v2331_v7  ;;  %2106 = vmatprep.mubr.msk.f32.mxu0 %vm2332_vm1, %v2333_v10 }
   0x3   :  { %35 = vadd.xlane.f32.xlu0 %v34_v1  ;;  %v66_v11 = vand.u32 4294901760, %v15_v8  ;;  %v1978_v29 = vld [vmem:[%s2506_s2] ss:$0 sm:$0xff]  ;;  %v1979_v31 = vld [vmem:[%s2506_s2 + $0x1] ss:$0 sm:$0xff] }
   0x4   :  { %v151_v15 = vsub.f32 %v16_v9, %v69_v12  ;;  %v1980_v40 = vld [vmem:[%s2506_s2 + $0x2] ss:$0 sm:$0xff] }
   0x5   :  { %v2229_v13 = vpack.c.bf16 %v69_v12, %v66_v11  ;;  %v144_v14 = vsub.f32 %v15_v8, %v66_v11 }
   0x6   :  { %v152_v17 = vand.u32 4294901760, %v151_v15 }
   0x7   :  { %2230 = vmatpush3.bf16.msra.mxu1 %v2229_v13  ;;  %v145_v16 = vand.u32 4294901760, %v144_v14  ;;  %v2235_v23 = vpack.c.bf16 %v151_v15, %v144_v14 }
   0x8   :  { %2231 = vmatprep.subr.bf16.mxu1 %v2331_v7  ;;  %v153_v19 = vsub.f32 %v151_v15, %v152_v17 }
   0x9   :  { %v146_v18 = vsub.f32 %v144_v14, %v145_v16  ;;  %v2241_v24 = vpack.c.bf16 %v152_v17, %v145_v16 }
   0xa   :  { %v154_v21 = vand.u32 4294901760, %v153_v19 }
   0xb   :  { %v147_v20 = vand.u32 4294901760, %v146_v18 }
   0xd   :  { %v2232_v22 = vpack.c.bf16 %v154_v21, %v147_v20 }
  0x90   :  { %v36_v2 = vpop.xlane.xlu0 %35 }
  0x91   :  { %v38_v3 = vmul.f32 0.0625, %v36_v2 }
  0x93   :  { %v39_v4 = vsub.f32 %v2357_v0, %v38_v3  ;;  %v17_v3 = vld [vmem:[%s2505_s1 + $0x10] sm:$0xff] }
  0x95   :  { %v40_v5 = vmul.f32 %v39_v4, %v39_v4 }
  0x97   :  { %v41_v6 = vsel %vm33_vm0, %v40_v5, 0.0 }
  0x98   :  { %42 = vadd.xlane.f32.xlu0 %v41_v6 }
 0x125   :  { %v43_v25 = vpop.xlane.xlu0 %42 }
 0x126   :  { %v44_v26 = vmul.f32 0.0625, %v43_v25 }
 0x128   :  { %v45_v27 = vadd.f32 1e-05, %v44_v26  ;;  %v1982_v26 = vld [vmem:[%s2506_s2 + $0x4] ss:$0 sm:$0xff] }
 0x12a   :  { %2325 = vrsqrt.f32 %v45_v27 }
 0x134   :  { %v2326_v28 = vpop.eup %2325 }
 0x135   :  { %v47_v30 = vmul.f32 %v2326_v28, %v39_v4  ;;  %v556_v4 = vand.u32 4294901760, %v17_v3 }
 0x137   :  { %v52_v32 = vmul.f32 %v1978_v29, %v47_v30  ;;  %v634_v8 = vsub.f32 %v17_v3, %v556_v4 }
 0x139   :  { %v57_v33 = vadd.f32 %v1979_v31, %v52_v32  ;;  %v635_v11 = vand.u32 4294901760, %v634_v8 }
 0x13b   :  { %v63_v34 = vsel %vm33_vm0, %v57_v33, 0 }
 0x13c   :  { %v132_v35 = vand.u32 4294901760, %v63_v34 }
 0x13e   :  { %v133_v36 = vsub.f32 %v63_v34, %v132_v35 }
 0x140   :  { %v134_v37 = vand.u32 4294901760, %v133_v36 }
 0x142   :  { %v135_v38 = vsub.f32 %v133_v36, %v134_v37 }
 0x144   :  { %v136_v39 = vand.u32 4294901760, %v135_v38 }
 0x146   :  { %2065 = vmatmul.mubr.f32.vlgmr.msra.gmra.mrb[0].mxu1 %v136_v39 }
 0x147   :  { %2233 = vmatpush3.bf16.msra.mxu1 %v2232_v22  ;;  %2071 = vmatprep.mubr.msk.f32.mxu1 %vm2332_vm1, %v2333_v10 }
 0x148   :  { %2234 = vmatprep.subr.bf16.mxu1 %v2331_v7 }
 0x14a   :  { %2072 = vmatmul.mubr.f32.vlgmr.msra.gmra.mrb[2].mxu1 %v132_v35 }
 0x14b   :  { %2236 = vmatpush3.bf16.msra.mxu1 %v2235_v23  ;;  %2078 = vmatprep.mubr.msk.f32.mxu1 %vm2332_vm1, %v2333_v10 }
 0x14c   :  { %2237 = vmatprep.subr.bf16.mxu1 %v2331_v7 }
 0x14e   :  { %2079 = vmatmul.mubr.f32.vlgmr.msra.gmra.mrb[4].mxu1 %v133_v36  ;;  %v20_v36 = vld [vmem:[%s2505_s1 + $0x28] sm:$0xff] }
 0x14f   :  { %2239 = vmatpush3.bf16.msra.mxu1 %v2229_v13  ;;  %2085 = vmatprep.mubr.msk.f32.mxu1 %vm2332_vm1, %v2333_v10  ;;  %v1030_v38 = vand.u32 4294901760, %v20_v36 }
 0x150   :  { %2240 = vmatprep.subr.bf16.mxu1 %v2331_v7 }
 0x152   :  { %2086 = vmatmul.mubr.f32.vlgmr.msra.gmra.mrb[6].mxu1 %v134_v37 }
 0x153   :  { %2242 = vmatpush3.bf16.msra.mxu1 %v2241_v24  ;;  %2092 = vmatprep.mubr.msk.f32.mxu1 %vm2332_vm1, %v2333_v10  ;;  %v1981_v24 = vld [vmem:[%s2506_s2 + $0x3] ss:$0 sm:$0xff] }
 0x154   :  { %2243 = vmatprep.subr.bf16.mxu1 %v2331_v7 }
 0x156   :  { %2093 = vmatmul.mubr.f32.vlgmr.msra.gmra.mrb[8].mxu1 %v132_v35 }
 0x157   :  { %2245 = vmatpush3.bf16.msra.mxu1 %v2229_v13  ;;  %2099 = vmatprep.mubr.msk.f32.mxu1 %vm2332_vm1, %v2333_v10  ;;  %v636_v13 = vsub.f32 %v634_v8, %v635_v11 }
 0x158   :  { %2264 = vmatprep.subr.bf16.mxu1 %v2331_v7 }
 0x159   :  { %v637_v15 = vand.u32 4294901760, %v636_v13 }
 0x15a   :  { %2100 = vmatmul.mubr.f32.vlgmr.msra.gmra.mrb[10].mxu1 %v132_v35  ;;  %v19_v35 = vld [vmem:[%s2505_s1 + $0x20] sm:$0xff] }
 0x15b   :  { %2148 = vmatprep.mubr.msk.f32.mxu1 %vm2332_vm1, %v2333_v10  ;;  %v1027_v37 = vand.u32 4294901760, %v19_v35 }
 0x15d   :  { %v1105_v39 = vsub.f32 %v19_v35, %v1027_v37 }
 0x219   :  { %v138_v41 = vpop.f32.mrb[0].mxu1 }
 0x21a   :  { %v2066_v42 = vpop.f32.mrb[1].mxu1  ;;  %v139_v43 = vadd.f32 %v1980_v40, %v138_v41  ;;  %v1112_v40 = vsub.f32 %v20_v36, %v1030_v38  ;;  %v2265_v41 = vpack.c.bf16 %v1030_v38, %v1027_v37 }
 0x21b   :  { %v1106_v42 = vand.u32 4294901760, %v1105_v39 }
 0x21c   :  { %2266 = vmatpush3.bf16.msra.mxu1 %v2265_v41 }
 0x21d   :  { %v219_v44 = vpop.f32.mrb[2].mxu1  ;;  %2267 = vmatprep.subr.bf16.mxu1 %v2331_v7 }
 0x21e   :  { %v220_v45 = vadd.f32 %v219_v44, %v139_v43  ;;  %v2073_v46 = vpop.f32.mrb[3].mxu1  ;;  %v1113_v43 = vand.u32 4294901760, %v1112_v40  ;;  %v1107_v44 = vsub.f32 %v1105_v39, %v1106_v42 }
 0x220   :  { %v1108_v46 = vand.u32 4294901760, %v1107_v44 }
 0x221   :  { %v295_v47 = vpop.f32.mrb[4].mxu1 }
 0x222   :  { %v296_v48 = vadd.f32 %v295_v47, %v220_v45  ;;  %v2080_v49 = vpop.f32.mrb[5].mxu1  ;;  %v1114_v45 = vsub.f32 %v1112_v40, %v1113_v43 }
 0x223   :  { %v2271_v49 = vpack.c.bf16 %v1112_v40, %v1105_v39 }
 0x224   :  { %v1115_v47 = vand.u32 4294901760, %v1114_v45 }
 0x225   :  { %v370_v50 = vpop.f32.mrb[6].mxu1 }
 0x226   :  { %v371_v51 = vadd.f32 %v370_v50, %v296_v48  ;;  %v2087_v52 = vpop.f32.mrb[7].mxu1  ;;  %v2268_v48 = vpack.c.bf16 %v1115_v47, %v1108_v46  ;;  %v2277_v50 = vpack.c.bf16 %v1113_v43, %v1106_v42 }
 0x229   :  { %v447_v53 = vpop.f32.mrb[8].mxu1 }
 0x22a   :  { %v448_v54 = vadd.f32 %v447_v53, %v371_v51  ;;  %v2094_v55 = vpop.f32.mrb[9].mxu1  ;;  %v1983_v51 = vld [vmem:[%s2506_s2 + $0x5] ss:$0 sm:$0xff] }
 0x22d   :  { %v520_v56 = vpop.f32.mrb[10].mxu1 }
 0x22e   :  { %v521_v57 = vadd.f32 %v520_v56, %v448_v54  ;;  %v2101_v58 = vpop.f32.mrb[11].mxu1 }
 0x230   :  { %v2404_v59 = vadd.f32 %v521_v57, %v2357_v0  ;;  %v18_v0 = vld [vmem:[%s2505_s1 + $0x18] sm:$0xff] }
 0x231   :  { %v559_v5 = vand.u32 4294901760, %v18_v0 }
 0x232   :  { %v525_v60 = vsel %vm33_vm0, %v2404_v59, 0.0 }
 0x233   :  { %526 = vadd.xlane.f32.xlu1 %v525_v60  ;;  %v2247_v6 = vpack.c.bf16 %v559_v5, %v556_v4  ;;  %v641_v9 = vsub.f32 %v18_v0, %v559_v5  ;;  %v21_v0 = vld [vmem:[%s2505_s1 + $0x30] sm:$0xff]  ;;  %v22_v4 = vld [vmem:[%s2505_s1 + $0x38] sm:$0xff] }
 0x234   :  { %v1494_v5 = vand.u32 4294901760, %v21_v0 }
 0x235   :  { %2248 = vmatpush3.bf16.msra.mxu0 %v2247_v6  ;;  %v642_v12 = vand.u32 4294901760, %v641_v9  ;;  %v2253_v18 = vpack.c.bf16 %v641_v9, %v634_v8 }
 0x236   :  { %2249 = vmatprep.subr.bf16.mxu0 %v2331_v7 }
 0x237   :  { %v643_v14 = vsub.f32 %v641_v9, %v642_v12  ;;  %v2259_v19 = vpack.c.bf16 %v642_v12, %v635_v11  ;;  %v1572_v9 = vsub.f32 %v21_v0, %v1494_v5 }
 0x239   :  { %v644_v16 = vand.u32 4294901760, %v643_v14  ;;  %v1573_v12 = vand.u32 4294901760, %v1572_v9 }
 0x23b   :  { %v2250_v17 = vpack.c.bf16 %v644_v16, %v637_v15  ;;  %v1574_v14 = vsub.f32 %v1572_v9, %v1573_v12 }
 0x23d   :  { %v1575_v16 = vand.u32 4294901760, %v1574_v14 }
 0x2c0   :  { %v527_v61 = vpop.xlane.xlu1 %526 }
 0x2c1   :  { %v528_v62 = vmul.f32 0.0625, %v527_v61 }
 0x2c3   :  { %v529_v63 = vsub.f32 %v2404_v59, %v528_v62 }
 0x2c5   :  { %v530_v1 = vmul.f32 %v529_v63, %v529_v63 }
 0x2c7   :  { %v531_v2 = vsel %vm33_vm0, %v530_v1, 0.0 }
 0x2c8   :  { %532 = vadd.xlane.f32.xlu1 %v531_v2 }
 0x355   :  { %v533_v20 = vpop.xlane.xlu1 %532 }
 0x356   :  { %v534_v21 = vmul.f32 0.0625, %v533_v20 }
 0x358   :  { %v535_v22 = vadd.f32 1e-05, %v534_v21  ;;  %v1984_v21 = vld [vmem:[%s2506_s2 + $0x6] ss:$0 sm:$0xff] }
 0x35a   :  { %2327 = vrsqrt.f32 %v535_v22 }
 0x364   :  { %v2328_v23 = vpop.eup %2327 }
 0x365   :  { %v537_v25 = vmul.f32 %v2328_v23, %v529_v63 }
 0x367   :  { %v542_v27 = vmul.f32 %v1981_v24, %v537_v25 }
 0x369   :  { %v547_v28 = vadd.f32 %v1982_v26, %v542_v27 }
 0x36b   :  { %v553_v29 = vsel %vm33_vm0, %v547_v28, 0 }
 0x36c   :  { %v622_v30 = vand.u32 4294901760, %v553_v29 }
 0x36e   :  { %v623_v31 = vsub.f32 %v553_v29, %v622_v30 }
 0x370   :  { %v624_v32 = vand.u32 4294901760, %v623_v31 }
 0x372   :  { %v625_v33 = vsub.f32 %v623_v31, %v624_v32 }
 0x374   :  { %v626_v34 = vand.u32 4294901760, %v625_v33 }
 0x376   :  { %2107 = vmatmul.mubr.f32.vlgmr.msra.gmra.mrb[0].mxu0 %v626_v34 }
 0x377   :  { %2251 = vmatpush3.bf16.msra.mxu0 %v2250_v17  ;;  %2113 = vmatprep.mubr.msk.f32.mxu0 %vm2332_vm1, %v2333_v10 }
 0x378   :  { %2252 = vmatprep.subr.bf16.mxu0 %v2331_v7 }
 0x37e   :  { %2114 = vmatmul.mubr.f32.vlgmr.msra.gmra.mrb[0].mxu0 %v622_v30 }
 0x37f   :  { %2254 = vmatpush3.bf16.msra.mxu0 %v2253_v18  ;;  %2120 = vmatprep.mubr.msk.f32.mxu0 %vm2332_vm1, %v2333_v10 }
 0x380   :  { %2255 = vmatprep.subr.bf16.mxu0 %v2331_v7 }
 0x386   :  { %2121 = vmatmul.mubr.f32.vlgmr.msra.gmra.mrb[0].mxu0 %v623_v31 }
 0x387   :  { %2257 = vmatpush3.bf16.msra.mxu0 %v2247_v6  ;;  %2127 = vmatprep.mubr.msk.f32.mxu0 %vm2332_vm1, %v2333_v10 }
 0x388   :  { %2258 = vmatprep.subr.bf16.mxu0 %v2331_v7 }
 0x38e   :  { %2128 = vmatmul.mubr.f32.vlgmr.msra.gmra.mrb[0].mxu0 %v624_v32 }
 0x38f   :  { %2260 = vmatpush3.bf16.msra.mxu0 %v2259_v19  ;;  %2134 = vmatprep.mubr.msk.f32.mxu0 %vm2332_vm1, %v2333_v10 }
 0x390   :  { %2261 = vmatprep.subr.bf16.mxu0 %v2331_v7 }
 0x396   :  { %2135 = vmatmul.mubr.f32.vlgmr.msra.gmra.mrb[0].mxu0 %v622_v30 }
 0x397   :  { %2263 = vmatpush3.bf16.msra.mxu0 %v2247_v6  ;;  %2141 = vmatprep.mubr.msk.f32.mxu0 %vm2332_vm1, %v2333_v10  ;;  %v1497_v6 = vand.u32 4294901760, %v22_v4 }
 0x398   :  { %2282 = vmatprep.subr.bf16.mxu0 %v2331_v7 }
 0x399   :  { %v2283_v8 = vpack.c.bf16 %v1497_v6, %v1494_v5  ;;  %v1579_v11 = vsub.f32 %v22_v4, %v1497_v6 }
 0x39b   :  { %v1580_v13 = vand.u32 4294901760, %v1579_v11  ;;  %v2289_v19 = vpack.c.bf16 %v1579_v11, %v1572_v9 }
 0x39d   :  { %v1581_v15 = vsub.f32 %v1579_v11, %v1580_v13  ;;  %v2295_v20 = vpack.c.bf16 %v1580_v13, %v1573_v12 }
 0x39e   :  { %2142 = vmatmul.mubr.f32.vlgmr.msra.gmra.mrb[0].mxu0 %v622_v30 }
 0x39f   :  { %2190 = vmatprep.mubr.msk.f32.mxu0 %vm2332_vm1, %v2333_v10  ;;  %2284 = vmatpush3.bf16.msra.mxu0 %v2283_v8  ;;  %v1582_v17 = vand.u32 4294901760, %v1581_v15 }
 0x3a0   :  { %2285 = vmatprep.subr.bf16.mxu0 %v2331_v7 }
 0x3a1   :  { %v2286_v18 = vpack.c.bf16 %v1582_v17, %v1575_v16 }
 0x471   :  { %v1010_v52 = vpop.f32.mrb[0].mxu0 }
 0x472   :  { %v2300_v53 = vadd.f32 %v1983_v51, %v1010_v52  ;;  %v2143_v54 = vpop.f32.mrb[1].mxu0  ;;  %v1986_v51 = vld [vmem:[%s2506_s2 + $0x8] ss:$0 sm:$0xff] }
 0x474   :  { %v1015_v55 = vmul.f32 0.70710677, %v2300_v53  ;;  %v1014_v57 = vmul.f32 0.5, %v2300_v53 }
 0x476   :  { %2329 = verf.f32 %v1015_v55 }
 0x480   :  { %v2330_v56 = vpop.eup %2329 }
 0x481   :  { %v1017_v58 = vadd.f32 1.0, %v2330_v56 }
 0x483   :  { %v1018_v60 = vmul.f32 %v1017_v58, %v1014_v57 }
 0x485   :  { %v1024_v61 = vsel %vm33_vm0, %v1018_v60, 0 }
 0x486   :  { %v1093_v62 = vand.u32 4294901760, %v1024_v61 }
 0x488   :  { %v1094_v63 = vsub.f32 %v1024_v61, %v1093_v62 }
 0x48a   :  { %v1095_v1 = vand.u32 4294901760, %v1094_v63 }
 0x48c   :  { %v1096_v2 = vsub.f32 %v1094_v63, %v1095_v1 }
 0x48e   :  { %v1097_v3 = vand.u32 4294901760, %v1096_v2 }
 0x490   :  { %2149 = vmatmul.mubr.f32.vlgmr.msra.gmra.mrb[12].mxu1 %v1097_v3 }
 0x491   :  { %2269 = vmatpush3.bf16.msra.mxu1 %v2268_v48  ;;  %2155 = vmatprep.mubr.msk.f32.mxu1 %vm2332_vm1, %v2333_v10 }
 0x492   :  { %2270 = vmatprep.subr.bf16.mxu1 %v2331_v7 }
 0x494   :  { %2156 = vmatmul.mubr.f32.vlgmr.msra.gmra.mrb[14].mxu1 %v1093_v62 }
 0x495   :  { %2272 = vmatpush3.bf16.msra.mxu1 %v2271_v49  ;;  %2162 = vmatprep.mubr.msk.f32.mxu1 %vm2332_vm1, %v2333_v10 }
 0x496   :  { %2273 = vmatprep.subr.bf16.mxu1 %v2331_v7 }
 0x498   :  { %2163 = vmatmul.mubr.f32.vlgmr.msra.gmra.mrb[16].mxu1 %v1094_v63 }
 0x499   :  { %2275 = vmatpush3.bf16.msra.mxu1 %v2265_v41  ;;  %2169 = vmatprep.mubr.msk.f32.mxu1 %vm2332_vm1, %v2333_v10 }
 0x49a   :  { %2276 = vmatprep.subr.bf16.mxu1 %v2331_v7 }
 0x49c   :  { %2170 = vmatmul.mubr.f32.vlgmr.msra.gmra.mrb[18].mxu1 %v1095_v1 }
 0x49d   :  { %2278 = vmatpush3.bf16.msra.mxu1 %v2277_v50  ;;  %2176 = vmatprep.mubr.msk.f32.mxu1 %vm2332_vm1, %v2333_v10 }
 0x49e   :  { %2279 = vmatprep.subr.bf16.mxu1 %v2331_v7 }
 0x4a0   :  { %2177 = vmatmul.mubr.f32.vlgmr.msra.gmra.mrb[20].mxu1 %v1093_v62 }
 0x4a1   :  { %2281 = vmatpush3.bf16.msra.mxu1 %v2265_v41  ;;  %2183 = vmatprep.mubr.msk.f32.mxu1 %vm2332_vm1, %v2333_v10 }
 0x4a4   :  { %2184 = vmatmul.mubr.f32.vlgmr.msra.gmra.mrb[22].mxu1 %v1093_v62 }
 0x563   :  { %v1099_v22 = vpop.f32.mrb[12].mxu1 }
 0x564   :  { %v2150_v23 = vpop.f32.mrb[13].mxu1  ;;  %v1100_v24 = vadd.f32 %v1984_v21, %v1099_v22 }
 0x567   :  { %v1180_v25 = vpop.f32.mrb[14].mxu1 }
 0x568   :  { %v1181_v26 = vadd.f32 %v1180_v25, %v1100_v24  ;;  %v2157_v27 = vpop.f32.mrb[15].mxu1 }
 0x56b   :  { %v1256_v28 = vpop.f32.mrb[16].mxu1 }
 0x56c   :  { %v1257_v29 = vadd.f32 %v1256_v28, %v1181_v26  ;;  %v2164_v30 = vpop.f32.mrb[17].mxu1 }
 0x56f   :  { %v1331_v31 = vpop.f32.mrb[18].mxu1 }
 0x570   :  { %v1332_v32 = vadd.f32 %v1331_v31, %v1257_v29  ;;  %v2171_v33 = vpop.f32.mrb[19].mxu1 }
 0x573   :  { %v1408_v34 = vpop.f32.mrb[20].mxu1 }
 0x574   :  { %v1409_v35 = vadd.f32 %v1408_v34, %v1332_v32  ;;  %v2178_v36 = vpop.f32.mrb[21].mxu1 }
 0x577   :  { %v1481_v37 = vpop.f32.mrb[22].mxu1 }
 0x578   :  { %v1482_v38 = vadd.f32 %v1481_v37, %v1409_v35  ;;  %v2185_v39 = vpop.f32.mrb[23].mxu1 }
 0x57a   :  { %v1485_v40 = vadd.f32 %v1482_v38, %v2404_v59  ;;  %v1985_v59 = vld [vmem:[%s2506_s2 + $0x7] ss:$0 sm:$0xff] }
 0x57c   :  { %v1491_v41 = vsel %vm33_vm0, %v1485_v40, 0 }
 0x57d   :  { %v1560_v42 = vand.u32 4294901760, %v1491_v41 }
 0x57f   :  { %v1561_v43 = vsub.f32 %v1491_v41, %v1560_v42 }
 0x581   :  { %v1562_v44 = vand.u32 4294901760, %v1561_v43 }
 0x583   :  { %v1563_v45 = vsub.f32 %v1561_v43, %v1562_v44 }
 0x585   :  { %v1564_v46 = vand.u32 4294901760, %v1563_v45 }
 0x587   :  { %2191 = vmatmul.mubr.f32.vlgmr.msra.gmra.mrb[2].mxu0 %v1564_v46 }
 0x588   :  { %2287 = vmatpush3.bf16.msra.mxu0 %v2286_v18  ;;  %2197 = vmatprep.mubr.msk.f32.mxu0 %vm2332_vm1, %v2333_v10 }
 0x589   :  { %2288 = vmatprep.subr.bf16.mxu0 %v2331_v7 }
 0x58f   :  { %2198 = vmatmul.mubr.f32.vlgmr.msra.gmra.mrb[2].mxu0 %v1560_v42 }
 0x590   :  { %2290 = vmatpush3.bf16.msra.mxu0 %v2289_v19  ;;  %2204 = vmatprep.mubr.msk.f32.mxu0 %vm2332_vm1, %v2333_v10 }
 0x591   :  { %2291 = vmatprep.subr.bf16.mxu0 %v2331_v7 }
 0x597   :  { %2205 = vmatmul.mubr.f32.vlgmr.msra.gmra.mrb[2].mxu0 %v1561_v43 }
 0x598   :  { %2293 = vmatpush3.bf16.msra.mxu0 %v2283_v8  ;;  %2211 = vmatprep.mubr.msk.f32.mxu0 %vm2332_vm1, %v2333_v10 }
 0x599   :  { %2294 = vmatprep.subr.bf16.mxu0 %v2331_v7 }
 0x59f   :  { %2212 = vmatmul.mubr.f32.vlgmr.msra.gmra.mrb[2].mxu0 %v1562_v44 }
 0x5a0   :  { %2296 = vmatpush3.bf16.msra.mxu0 %v2295_v20  ;;  %2218 = vmatprep.mubr.msk.f32.mxu0 %vm2332_vm1, %v2333_v10 }
 0x5a1   :  { %2297 = vmatprep.subr.bf16.mxu0 %v2331_v7 }
 0x5a7   :  { %2219 = vmatmul.mubr.f32.vlgmr.msra.gmra.mrb[2].mxu0 %v1560_v42 }
 0x5a8   :  { %2299 = vmatpush3.bf16.msra.mxu0 %v2283_v8  ;;  %2225 = vmatprep.mubr.msk.f32.mxu0 %vm2332_vm1, %v2333_v10  ;;  %v1987_v10 = vld [vmem:[%s2506_s2 + $0x9] ss:$0 sm:$0xff] }
 0x5af   :  { %2226 = vmatmul.mubr.f32.vlgmr.msra.gmra.mrb[2].mxu0 %v1560_v42 }
 0x682   :  { %v1948_v47 = vpop.f32.mrb[2].mxu0 }
 0x683   :  { %v2301_v48 = vadd.f32 %v1985_v59, %v1948_v47  ;;  %v2227_v49 = vpop.f32.mrb[3].mxu0 }
 0x685   :  { %vm1952_vm2 = vcmp.ge.f32.partialorder %v2301_v48, 0.0  ;;  %v1953_v50 = vmul.f32 0.01, %v2301_v48 }
 0x687   :  { %v1954_v7 = vsel %vm1952_vm2, %v2301_v48, %v1953_v50 }
 0x688   :  { %v1959_v52 = vmul.f32 %v1986_v51, %v1954_v7 }
 0x68a   :  { %v1961_v53 = vsel %vm1960_vm3, %v1959_v52, 0.0 }
 0x68b   :  { %1962 = vadd.xlane.f32.xlu0 %v1961_v53 }
 0x718   :  { %v1963_v54 = vpop.xlane.xlu0 %1962 }
 0x719   :  { %v1968_v55 = vadd.f32 %v1987_v10, %v1963_v54 }
 0x71b   :  { %vm1969_vm5 = vcmp.ge.f32.partialorder %v1968_v55, 0.0  ;;  %v1970_v56 = vmul.f32 0.01, %v1968_v55 }
 0x71d   :  { %v1971_v57 = vsel %vm1969_vm5, %v1968_v55, %v1970_v56 }
 0x71e   :  { %1973 = vst.msk [vmem:[%s2507_s3] sm:$0xff] %vm1972_vm4, %v1971_v57 }

</bundles_post_ra>
